<compile_context>
chip_gen: v7x
topology: tpu7x:2x2x1
jax: 0.10.0
libtpu: 0.0.40
codegen_flags: <defaults>
</compile_context>

<pallas_src>
import functools

import jax
import jax.numpy as jnp
from jax import lax
from jax.experimental import pallas as pl
from jax.experimental.pallas import tpu as pltpu

LANE = 128          # vreg lane width; mean/sig halves live on 128-lane boundaries
SLAB = 2 * LANE     # 256-lane slabs for the x/eps input and each head output


# ---------------- in-kernel helpers ----------------

def _relu(x):
    return jnp.maximum(x, 0.0)


def _softplus(x):
    # numerically stable softplus (matches torch.nn.Softplus, beta=1)
    return jnp.maximum(x, 0.0) + jnp.log1p(jnp.exp(-jnp.abs(x)))


def _dot(a, b):
    return jnp.dot(a, b, preferred_element_type=jnp.float32)


# ---------------- fused kernel ----------------

def vae_fused_kernel(act_ref, wsm_ref, wbig_ref, wh0_ref, wh1_ref, b_ref, out_ref):
    f32 = jnp.float32

    def w(ref, idx):                      # bf16 weight -> f32 (VPU convert, cheap)
        return ref[idx].astype(f32)

    def b(idx, width):                    # (1, width) f32 bias row
        return b_ref[pl.ds(idx, 1), pl.ds(0, width)]

    act = act_ref[...]                    # (B, 256): x @ [0:x_dim], eps @ [128:128+z_dim]
    x_in = act[:, :64]                    # padded lanes are 0; weight rows beyond x_dim are 0
    eps = act[:, LANE:]                   # (B, 128), lanes beyond z_dim are 0

    lane = lax.broadcasted_iota(jnp.int32, (act.shape[0], SLAB), 1)

    # ---------------- encoder ----------------
    h = _relu(_dot(x_in, w(wsm_ref, 0)) + b(0, SLAB))      # x -> 256
    h = _relu(_dot(h, w(wbig_ref, 0)) + b(1, SLAB))        # 256 -> 256
    h = _relu(_dot(h, w(wh0_ref, 0)) + b(2, LANE))         # 256 -> 64|64 (mean|sig)
    h = _relu(_dot(h, w(wh1_ref, 0)) + b(3, 64))           # block-diag 64|64 -> 32|32
    pre = _dot(h, w(wsm_ref, 2)) + b(4, SLAB)              # mean @ [0:z], sig @ [128:128+z]
    enc_out = jnp.where(lane < LANE, pre, _softplus(pre))  # softplus only on the sig half
    out_ref[:, :SLAB] = enc_out

    # ------------- reparameterize (padded lanes stay exactly 0) -------------
    z = enc_out[:, :LANE] + enc_out[:, LANE:] * eps         # (B, 128)

    # ---------------- decoder ----------------
    h = _relu(_dot(z[:, :64], w(wsm_ref, 1)) + b(5, SLAB))  # z -> 256
    h = _relu(_dot(h, w(wbig_ref, 1)) + b(6, SLAB))         # 256 -> 256
    h = _relu(_dot(h, w(wbig_ref, 2)) + b(7, SLAB))         # 256 -> 256
    h = _relu(_dot(h, w(wh0_ref, 1)) + b(8, LANE))          # 256 -> 64|64
    h = _relu(_dot(h, w(wh1_ref, 1)) + b(9, 64))            # block-diag 64|64 -> 32|32
    pre = _dot(h, w(wsm_ref, 3)) + b(10, SLAB)              # mean @ [0:x], sig @ [128:128+x]
    dec_out = jnp.where(lane < LANE, pre, _softplus(pre))
    out_ref[:, SLAB:] = dec_out


# ---------------- wrapper ----------------

_VMEM = functools.partial(pl.BlockSpec, memory_space=pltpu.MemorySpace.VMEM)


def vae_forward(x, eps, packed_params, x_dim, z_dim):
    w_small, w_big, w_head0, w_head1, bias = packed_params
    B = x.shape[0]

    # merged lane-dense input slab: x @ [0:x_dim], eps @ [128:128+z_dim]
    act = jnp.zeros((B, SLAB), jnp.float32)
    act = act.at[:, :x_dim].set(x).at[:, LANE:LANE + z_dim].set(eps)

    # real (unpadded) per-layer dims for the cost hint
    dims = ([(x_dim, 256), (256, 256)] + [(256, 64), (64, 32), (32, z_dim)] * 2
            + [(z_dim, 256), (256, 256), (256, 256)]
            + [(256, 64), (64, 32), (32, x_dim)] * 2)
    flops = 2 * B * sum(i * o for i, o in dims)
    arrays = (act, w_small, w_big, w_head0, w_head1, bias)
    bytes_accessed = int(sum(a.size * a.dtype.itemsize for a in arrays)) + B * 2 * SLAB * 4
    cost = pl.CostEstimate(flops=flops,
                           transcendentals=2 * B * (z_dim + x_dim),  # softplus = exp + log1p
                           bytes_accessed=bytes_accessed)

    out = pl.pallas_call(
        vae_fused_kernel,
        out_shape=jax.ShapeDtypeStruct((B, 2 * SLAB), jnp.float32),
        in_specs=[_VMEM() for _ in range(6)],
        out_specs=_VMEM(),
        cost_estimate=cost,
    )(act, w_small, w_big, w_head0, w_head1, bias)

    z_means = out[:, 0:z_dim]
    z_sigs = out[:, LANE:LANE + z_dim]
    x_means = out[:, SLAB:SLAB + x_dim]
    x_sigs = out[:, SLAB + LANE:SLAB + LANE + x_dim]
    return x_means, x_sigs, z_means, z_sigs


# ---------------- parameter packing (host side, runs once) ----------------

def _pad2d(a, rows, cols):
    return jnp.pad(a, ((0, rows - a.shape[0]), (0, cols - a.shape[1])))


def _block_diag(a, b):
    ra, ca = a.shape
    rb, cb = b.shape
    top = jnp.concatenate([a, jnp.zeros((ra, cb), a.dtype)], axis=1)
    bot = jnp.concatenate([jnp.zeros((rb, ca), b.dtype), b], axis=1)
    return jnp.concatenate([top, bot], axis=0)


def _final_head(w_mean, w_sig, b_mean, b_sig, out_dim):
    """Final fused head layer: in = 32|32, mean out lanes [0:out_dim], sig lanes [128:128+out_dim]."""
    w = jnp.zeros((64, SLAB), jnp.float32)
    w = w.at[:32, :out_dim].set(w_mean).at[32:64, LANE:LANE + out_dim].set(w_sig)
    b = jnp.zeros((1, SLAB), jnp.float32)
    b = b.at[:, :out_dim].set(b_mean).at[:, LANE:LANE + out_dim].set(b_sig)
    return w, b


def pack_vae_params(enc, dec, x_dim, z_dim, weight_dtype=jnp.bfloat16):
    # Encoder raw params: emb(2 layers) + mean(3) + sig(3)
    (we0, be0, we1, be1,
     wm0, bm0, wm1, bm1, wm2, bm2,
     ws0, bs0, ws1, bs1, ws2, bs2) = enc
    # Decoder raw params: emb(3 layers) + mean(3) + sig(3)
    (wd0, bd0, wd1, bd1, wd2, bd2,
     vm0, cm0, vm1, cm1, vm2, cm2,
     vs0, cs0, vs1, cs1, vs2, cs2) = dec

    e_final_w, e_final_b = _final_head(wm2, ws2, bm2, bs2, z_dim)
    d_final_w, d_final_b = _final_head(vm2, vs2, cm2, cs2, x_dim)

    # shape-class blobs (zero padding is exact: padded rows/cols/bias lanes are 0,
    # ReLU keeps them 0, padded z lanes are 0)
    w_small = jnp.stack([_pad2d(we0, 64, SLAB), _pad2d(wd0, 64, SLAB),
                         e_final_w, d_final_w]).astype(weight_dtype)              # (4, 64, 256)
    w_big = jnp.stack([we1, wd1, wd2]).astype(weight_dtype)                       # (3, 256, 256)
    w_head0 = jnp.stack([jnp.concatenate([wm0, ws0], axis=1),
                         jnp.concatenate([vm0, vs0], axis=1)]).astype(weight_dtype)  # (2, 256, 128)
    w_head1 = jnp.stack([_block_diag(wm1, ws1),
                         _block_diag(vm1, vs1)]).astype(weight_dtype)             # (2, 128, 64)

    bias_rows = [
        _pad2d(be0, 1, SLAB), _pad2d(be1, 1, SLAB),
        _pad2d(jnp.concatenate([bm0, bs0], axis=1), 1, SLAB),
        _pad2d(jnp.concatenate([bm1, bs1], axis=1), 1, SLAB),
        e_final_b,
        _pad2d(bd0, 1, SLAB), _pad2d(bd1, 1, SLAB), _pad2d(bd2, 1, SLAB),
        _pad2d(jnp.concatenate([cm0, cs0], axis=1), 1, SLAB),
        _pad2d(jnp.concatenate([cm1, cs1], axis=1), 1, SLAB),
        d_final_b,
    ]
    bias = jnp.concatenate(bias_rows, axis=0).astype(jnp.float32)                 # (11, 256)
    return w_small, w_big, w_head0, w_head1, bias


# ---------------- deterministic parameter init ----------------

def init_linear(key, fan_in, fan_out):
    kw, kb = jax.random.split(key)
    bound = 1.0 / (fan_in ** 0.5)
    w = jax.random.uniform(kw, (fan_in, fan_out), jnp.float32, -bound, bound)
    b = jax.random.uniform(kb, (1, fan_out), jnp.float32, -bound, bound)
    return w, b


def init_mlp_params(key, dims):
    params = []
    for i in range(len(dims) - 1):
        key, sub = jax.random.split(key)
        w, b = init_linear(sub, dims[i], dims[i + 1])
        params.extend([w, b])
    return params


def init_vae_params(key, x_dim, z_dim,
                    enc_h=(256, 256, 64, 32), dec_h=(256, 256, 64, 32)):
    k_e_emb, k_e_m, k_e_s, k_d_emb, k_d_m, k_d_s = jax.random.split(key, 6)
    enc = (init_mlp_params(k_e_emb, [x_dim, enc_h[0], enc_h[1]])
           + init_mlp_params(k_e_m, [enc_h[1], enc_h[2], enc_h[3], z_dim])
           + init_mlp_params(k_e_s, [enc_h[1], enc_h[2], enc_h[3], z_dim]))
    dec = (init_mlp_params(k_d_emb, [z_dim, dec_h[0], dec_h[0], dec_h[1]])
           + init_mlp_params(k_d_m, [dec_h[1], dec_h[2], dec_h[3], x_dim])
           + init_mlp_params(k_d_s, [dec_h[1], dec_h[2], dec_h[3], x_dim]))
    return enc, dec


def bf16_round_weights(params):
    """Round the weight matrices (even indices) through bf16, keep biases f32."""
    out = []
    for i, p in enumerate(params):
        if i % 2 == 0:
            p = p.astype(jnp.bfloat16).astype(jnp.float32)
        out.append(p)
    return out


# ---------------- pure-JAX reference (operates on UNPACKED params) ----------------

def _ref_mlp(x, params, acts):
    h = x
    for i, act in enumerate(acts):
        w, b = params[2 * i], params[2 * i + 1]
        h = jnp.dot(h, w, precision=jax.lax.Precision.HIGHEST) + b
        if act == "relu":
            h = jnp.maximum(h, 0.0)
        elif act == "softplus":
            h = jnp.maximum(h, 0.0) + jnp.log1p(jnp.exp(-jnp.abs(h)))
    return h


def ref_forward(x, eps, enc, dec):
    e_emb, e_mean, e_sig = enc[0:4], enc[4:10], enc[10:16]
    d_emb, d_mean, d_sig = dec[0:6], dec[6:12], dec[12:18]
    h = _ref_mlp(x, e_emb, ["relu", "relu"])
    z_means = _ref_mlp(h, e_mean, ["relu", "relu", "none"])
    z_sigs = _ref_mlp(h, e_sig, ["relu", "relu", "softplus"])
    z = z_means + z_sigs * eps
    h = _ref_mlp(z, d_emb, ["relu", "relu", "relu"])
    x_means = _ref_mlp(h, d_mean, ["relu", "relu", "none"])
    x_sigs = _ref_mlp(h, d_sig, ["relu", "relu", "softplus"])
    return x_means, x_sigs, z_means, z_sigs


# ---------------- main ----------------

if __name__ == "__main__":
    B, X_DIM, Z_DIM = 8, 16, 8

    key = jax.random.PRNGKey(0)
    k_params, k_x, k_eps = jax.random.split(key, 3)

    enc_params, dec_params = init_vae_params(k_params, X_DIM, Z_DIM)
    packed = pack_vae_params(enc_params, dec_params, X_DIM, Z_DIM)

    x = jax.random.normal(k_x, (B, X_DIM), jnp.float32)
    eps = jax.random.normal(k_eps, (B, Z_DIM), jnp.float32)  # reparameterization noise

    outs = vae_forward(x, eps, packed, X_DIM, Z_DIM)
    outs = jax.block_until_ready(outs)
    x_means, x_sigs, z_means, z_sigs = outs

    # validate against a pure-JAX reference built from the SAME bf16-rounded weights
    # (f32 biases/activations), so the comparison isolates kernel packing/compute.
    enc_ref = bf16_round_weights(enc_params)
    dec_ref = bf16_round_weights(dec_params)
    refs = ref_forward(x, eps, enc_ref, dec_ref)
    for got, want in zip(outs, refs):
        assert got.shape == want.shape
        assert jnp.allclose(got, want, atol=1e-3, rtol=1e-3), "mismatch vs reference"

    print("KERNEL_OK")
</pallas_src>

<mosaic_0001>
module attributes {stable_mosaic.version = 11 : i64} {
  func.func @vae_fused_kernel(%arg0: memref<8x256xf32, #tpu.memory_space<vmem>>, %arg1: memref<4x64x256xbf16, #tpu.memory_space<vmem>>, %arg2: memref<3x256x256xbf16, #tpu.memory_space<vmem>>, %arg3: memref<2x256x128xbf16, #tpu.memory_space<vmem>>, %arg4: memref<2x128x64xbf16, #tpu.memory_space<vmem>>, %arg5: memref<11x256xf32, #tpu.memory_space<vmem>>, %arg6: memref<8x512xf32, #tpu.memory_space<vmem>>) attributes {dimension_semantics = [], scalar_prefetch = 0 : i64, scratch_operands = 0 : i64, tpu.core_type = #tpu.core_type<tc>} {
    %c0 = arith.constant 0 : index
    %c0_0 = arith.constant 0 : index
    %0 = vector.load %arg0[%c0, %c0_0] : memref<8x256xf32, #tpu.memory_space<vmem>>, vector<8x256xf32>
    %1 = vector.extract_strided_slice %0 {offsets = [0, 0], sizes = [8, 64], strides = [1, 1]} : vector<8x256xf32> to vector<8x64xf32>
    %2 = vector.extract_strided_slice %0 {offsets = [0, 128], sizes = [8, 128], strides = [1, 1]} : vector<8x256xf32> to vector<8x128xf32>
    %3 = tpu.iota {dimensions = array<i32: 1>} : vector<8x256xi32>
    %c0_1 = arith.constant 0 : index
    %c0_2 = arith.constant 0 : index
    %c0_3 = arith.constant 0 : index
    %4 = vector.load %arg1[%c0_1, %c0_2, %c0_3] : memref<4x64x256xbf16, #tpu.memory_space<vmem>>, vector<1x64x256xbf16>
    %5 = vector.shape_cast %4 : vector<1x64x256xbf16> to vector<64x256xbf16>
    %6 = arith.extf %5 : vector<64x256xbf16> to vector<64x256xf32>
    %cst = arith.constant dense<0.000000e+00> : vector<8x256xf32>
    %7 = tpu.matmul %1, %6, %cst {dimension_numbers = #tpu.dot_dimension_numbers<[1], [0], [0], [1], [0, 0, 1, 1], [], []>} : vector<8x64xf32>, vector<64x256xf32>, vector<8x256xf32> -> vector<8x256xf32>
    %c0_4 = arith.constant 0 : index
    %c0_5 = arith.constant 0 : index
    %8 = vector.load %arg5[%c0_4, %c0_5] : memref<11x256xf32, #tpu.memory_space<vmem>>, vector<1x256xf32>
    %9 = vector.broadcast %8 : vector<1x256xf32> to vector<8x256xf32>
    %10 = arith.addf %7, %9 : vector<8x256xf32>
    %cst_6 = arith.constant 0.000000e+00 : f32
    %11 = vector.broadcast %cst_6 : f32 to vector<8x256xf32>
    %12 = arith.maximumf %10, %11 : vector<8x256xf32>
    %c0_7 = arith.constant 0 : index
    %c0_8 = arith.constant 0 : index
    %c0_9 = arith.constant 0 : index
    %13 = vector.load %arg2[%c0_7, %c0_8, %c0_9] : memref<3x256x256xbf16, #tpu.memory_space<vmem>>, vector<1x256x256xbf16>
    %14 = vector.shape_cast %13 : vector<1x256x256xbf16> to vector<256x256xbf16>
    %15 = arith.extf %14 : vector<256x256xbf16> to vector<256x256xf32>
    %cst_10 = arith.constant dense<0.000000e+00> : vector<8x256xf32>
    %16 = tpu.matmul %12, %15, %cst_10 {dimension_numbers = #tpu.dot_dimension_numbers<[1], [0], [0], [1], [0, 0, 1, 1], [], []>} : vector<8x256xf32>, vector<256x256xf32>, vector<8x256xf32> -> vector<8x256xf32>
    %c1 = arith.constant 1 : index
    %c0_11 = arith.constant 0 : index
    %17 = vector.load %arg5[%c1, %c0_11] : memref<11x256xf32, #tpu.memory_space<vmem>>, vector<1x256xf32>
    %18 = vector.broadcast %17 : vector<1x256xf32> to vector<8x256xf32>
    %19 = arith.addf %16, %18 : vector<8x256xf32>
    %cst_12 = arith.constant 0.000000e+00 : f32
    %20 = vector.broadcast %cst_12 : f32 to vector<8x256xf32>
    %21 = arith.maximumf %19, %20 : vector<8x256xf32>
    %c0_13 = arith.constant 0 : index
    %c0_14 = arith.constant 0 : index
    %c0_15 = arith.constant 0 : index
    %22 = vector.load %arg3[%c0_13, %c0_14, %c0_15] : memref<2x256x128xbf16, #tpu.memory_space<vmem>>, vector<1x256x128xbf16>
    %23 = vector.shape_cast %22 : vector<1x256x128xbf16> to vector<256x128xbf16>
    %24 = arith.extf %23 : vector<256x128xbf16> to vector<256x128xf32>
    %cst_16 = arith.constant dense<0.000000e+00> : vector<8x128xf32>
    %25 = tpu.matmul %21, %24, %cst_16 {dimension_numbers = #tpu.dot_dimension_numbers<[1], [0], [0], [1], [0, 0, 1, 1], [], []>} : vector<8x256xf32>, vector<256x128xf32>, vector<8x128xf32> -> vector<8x128xf32>
    %c2 = arith.constant 2 : index
    %c0_17 = arith.constant 0 : index
    %26 = vector.load %arg5[%c2, %c0_17] : memref<11x256xf32, #tpu.memory_space<vmem>>, vector<1x128xf32>
    %27 = vector.broadcast %26 : vector<1x128xf32> to vector<8x128xf32>
    %28 = arith.addf %25, %27 : vector<8x128xf32>
    %cst_18 = arith.constant 0.000000e+00 : f32
    %29 = vector.broadcast %cst_18 : f32 to vector<8x128xf32>
    %30 = arith.maximumf %28, %29 : vector<8x128xf32>
    %c0_19 = arith.constant 0 : index
    %c0_20 = arith.constant 0 : index
    %c0_21 = arith.constant 0 : index
    %31 = vector.load %arg4[%c0_19, %c0_20, %c0_21] : memref<2x128x64xbf16, #tpu.memory_space<vmem>>, vector<1x128x64xbf16>
    %32 = vector.shape_cast %31 : vector<1x128x64xbf16> to vector<128x64xbf16>
    %33 = arith.extf %32 : vector<128x64xbf16> to vector<128x64xf32>
    %cst_22 = arith.constant dense<0.000000e+00> : vector<8x64xf32>
    %34 = tpu.matmul %30, %33, %cst_22 {dimension_numbers = #tpu.dot_dimension_numbers<[1], [0], [0], [1], [0, 0, 1, 1], [], []>} : vector<8x128xf32>, vector<128x64xf32>, vector<8x64xf32> -> vector<8x64xf32>
    %c3 = arith.constant 3 : index
    %c0_23 = arith.constant 0 : index
    %35 = vector.load %arg5[%c3, %c0_23] : memref<11x256xf32, #tpu.memory_space<vmem>>, vector<1x64xf32>
    %36 = vector.broadcast %35 : vector<1x64xf32> to vector<8x64xf32>
    %37 = arith.addf %34, %36 : vector<8x64xf32>
    %cst_24 = arith.constant 0.000000e+00 : f32
    %38 = vector.broadcast %cst_24 : f32 to vector<8x64xf32>
    %39 = arith.maximumf %37, %38 : vector<8x64xf32>
    %c2_25 = arith.constant 2 : index
    %c0_26 = arith.constant 0 : index
    %c0_27 = arith.constant 0 : index
    %40 = vector.load %arg1[%c2_25, %c0_26, %c0_27] : memref<4x64x256xbf16, #tpu.memory_space<vmem>>, vector<1x64x256xbf16>
    %41 = vector.shape_cast %40 : vector<1x64x256xbf16> to vector<64x256xbf16>
    %42 = arith.extf %41 : vector<64x256xbf16> to vector<64x256xf32>
    %cst_28 = arith.constant dense<0.000000e+00> : vector<8x256xf32>
    %43 = tpu.matmul %39, %42, %cst_28 {dimension_numbers = #tpu.dot_dimension_numbers<[1], [0], [0], [1], [0, 0, 1, 1], [], []>} : vector<8x64xf32>, vector<64x256xf32>, vector<8x256xf32> -> vector<8x256xf32>
    %c4 = arith.constant 4 : index
    %c0_29 = arith.constant 0 : index
    %44 = vector.load %arg5[%c4, %c0_29] : memref<11x256xf32, #tpu.memory_space<vmem>>, vector<1x256xf32>
    %45 = vector.broadcast %44 : vector<1x256xf32> to vector<8x256xf32>
    %46 = arith.addf %43, %45 : vector<8x256xf32>
    %c128_i32 = arith.constant 128 : i32
    %47 = vector.broadcast %c128_i32 : i32 to vector<8x256xi32>
    %48 = arith.cmpi slt, %3, %47 : vector<8x256xi32>
    %cst_30 = arith.constant 0.000000e+00 : f32
    %49 = vector.broadcast %cst_30 : f32 to vector<8x256xf32>
    %50 = arith.maximumf %46, %49 : vector<8x256xf32>
    %51 = math.absf %46 : vector<8x256xf32>
    %cst_31 = arith.constant 0.000000e+00 : f32
    %52 = vector.broadcast %cst_31 : f32 to vector<8x256xf32>
    %53 = arith.subf %52, %51 : vector<8x256xf32>
    %54 = math.exp %53 : vector<8x256xf32>
    %55 = math.log1p %54 : vector<8x256xf32>
    %56 = arith.addf %50, %55 : vector<8x256xf32>
    %57 = arith.select %48, %46, %56 : vector<8x256xi1>, vector<8x256xf32>
    %c0_32 = arith.constant 0 : index
    %c0_33 = arith.constant 0 : index
    %58 = vector.load %arg6[%c0_32, %c0_33] : memref<8x512xf32, #tpu.memory_space<vmem>>, vector<8x256xf32>
    tpu.vector_store %arg6[%c0_32, %c0_33], %57 {strides = array<i32>} : memref<8x512xf32, #tpu.memory_space<vmem>>, vector<8x256xf32>,
    %59 = vector.extract_strided_slice %57 {offsets = [0, 0], sizes = [8, 128], strides = [1, 1]} : vector<8x256xf32> to vector<8x128xf32>
    %60 = vector.extract_strided_slice %57 {offsets = [0, 128], sizes = [8, 128], strides = [1, 1]} : vector<8x256xf32> to vector<8x128xf32>
    %61 = arith.mulf %60, %2 : vector<8x128xf32>
    %62 = arith.addf %59, %61 : vector<8x128xf32>
    %63 = vector.extract_strided_slice %62 {offsets = [0, 0], sizes = [8, 64], strides = [1, 1]} : vector<8x128xf32> to vector<8x64xf32>
    %c1_34 = arith.constant 1 : index
    %c0_35 = arith.constant 0 : index
    %c0_36 = arith.constant 0 : index
    %64 = vector.load %arg1[%c1_34, %c0_35, %c0_36] : memref<4x64x256xbf16, #tpu.memory_space<vmem>>, vector<1x64x256xbf16>
    %65 = vector.shape_cast %64 : vector<1x64x256xbf16> to vector<64x256xbf16>
    %66 = arith.extf %65 : vector<64x256xbf16> to vector<64x256xf32>
    %cst_37 = arith.constant dense<0.000000e+00> : vector<8x256xf32>
    %67 = tpu.matmul %63, %66, %cst_37 {dimension_numbers = #tpu.dot_dimension_numbers<[1], [0], [0], [1], [0, 0, 1, 1], [], []>} : vector<8x64xf32>, vector<64x256xf32>, vector<8x256xf32> -> vector<8x256xf32>
    %c5 = arith.constant 5 : index
    %c0_38 = arith.constant 0 : index
    %68 = vector.load %arg5[%c5, %c0_38] : memref<11x256xf32, #tpu.memory_space<vmem>>, vector<1x256xf32>
    %69 = vector.broadcast %68 : vector<1x256xf32> to vector<8x256xf32>
    %70 = arith.addf %67, %69 : vector<8x256xf32>
    %cst_39 = arith.constant 0.000000e+00 : f32
    %71 = vector.broadcast %cst_39 : f32 to vector<8x256xf32>
    %72 = arith.maximumf %70, %71 : vector<8x256xf32>
    %c1_40 = arith.constant 1 : index
    %c0_41 = arith.constant 0 : index
    %c0_42 = arith.constant 0 : index
    %73 = vector.load %arg2[%c1_40, %c0_41, %c0_42] : memref<3x256x256xbf16, #tpu.memory_space<vmem>>, vector<1x256x256xbf16>
    %74 = vector.shape_cast %73 : vector<1x256x256xbf16> to vector<256x256xbf16>
    %75 = arith.extf %74 : vector<256x256xbf16> to vector<256x256xf32>
    %cst_43 = arith.constant dense<0.000000e+00> : vector<8x256xf32>
    %76 = tpu.matmul %72, %75, %cst_43 {dimension_numbers = #tpu.dot_dimension_numbers<[1], [0], [0], [1], [0, 0, 1, 1], [], []>} : vector<8x256xf32>, vector<256x256xf32>, vector<8x256xf32> -> vector<8x256xf32>
    %c6 = arith.constant 6 : index
    %c0_44 = arith.constant 0 : index
    %77 = vector.load %arg5[%c6, %c0_44] : memref<11x256xf32, #tpu.memory_space<vmem>>, vector<1x256xf32>
    %78 = vector.broadcast %77 : vector<1x256xf32> to vector<8x256xf32>
    %79 = arith.addf %76, %78 : vector<8x256xf32>
    %cst_45 = arith.constant 0.000000e+00 : f32
    %80 = vector.broadcast %cst_45 : f32 to vector<8x256xf32>
    %81 = arith.maximumf %79, %80 : vector<8x256xf32>
    %c2_46 = arith.constant 2 : index
    %c0_47 = arith.constant 0 : index
    %c0_48 = arith.constant 0 : index
    %82 = vector.load %arg2[%c2_46, %c0_47, %c0_48] : memref<3x256x256xbf16, #tpu.memory_space<vmem>>, vector<1x256x256xbf16>
    %83 = vector.shape_cast %82 : vector<1x256x256xbf16> to vector<256x256xbf16>
    %84 = arith.extf %83 : vector<256x256xbf16> to vector<256x256xf32>
    %cst_49 = arith.constant dense<0.000000e+00> : vector<8x256xf32>
    %85 = tpu.matmul %81, %84, %cst_49 {dimension_numbers = #tpu.dot_dimension_numbers<[1], [0], [0], [1], [0, 0, 1, 1], [], []>} : vector<8x256xf32>, vector<256x256xf32>, vector<8x256xf32> -> vector<8x256xf32>
    %c7 = arith.constant 7 : index
    %c0_50 = arith.constant 0 : index
    %86 = vector.load %arg5[%c7, %c0_50] : memref<11x256xf32, #tpu.memory_space<vmem>>, vector<1x256xf32>
    %87 = vector.broadcast %86 : vector<1x256xf32> to vector<8x256xf32>
    %88 = arith.addf %85, %87 : vector<8x256xf32>
    %cst_51 = arith.constant 0.000000e+00 : f32
    %89 = vector.broadcast %cst_51 : f32 to vector<8x256xf32>
    %90 = arith.maximumf %88, %89 : vector<8x256xf32>
    %c1_52 = arith.constant 1 : index
    %c0_53 = arith.constant 0 : index
    %c0_54 = arith.constant 0 : index
    %91 = vector.load %arg3[%c1_52, %c0_53, %c0_54] : memref<2x256x128xbf16, #tpu.memory_space<vmem>>, vector<1x256x128xbf16>
    %92 = vector.shape_cast %91 : vector<1x256x128xbf16> to vector<256x128xbf16>
    %93 = arith.extf %92 : vector<256x128xbf16> to vector<256x128xf32>
    %cst_55 = arith.constant dense<0.000000e+00> : vector<8x128xf32>
    %94 = tpu.matmul %90, %93, %cst_55 {dimension_numbers = #tpu.dot_dimension_numbers<[1], [0], [0], [1], [0, 0, 1, 1], [], []>} : vector<8x256xf32>, vector<256x128xf32>, vector<8x128xf32> -> vector<8x128xf32>
    %c8 = arith.constant 8 : index
    %c0_56 = arith.constant 0 : index
    %95 = vector.load %arg5[%c8, %c0_56] : memref<11x256xf32, #tpu.memory_space<vmem>>, vector<1x128xf32>
    %96 = vector.broadcast %95 : vector<1x128xf32> to vector<8x128xf32>
    %97 = arith.addf %94, %96 : vector<8x128xf32>
    %cst_57 = arith.constant 0.000000e+00 : f32
    %98 = vector.broadcast %cst_57 : f32 to vector<8x128xf32>
    %99 = arith.maximumf %97, %98 : vector<8x128xf32>
    %c1_58 = arith.constant 1 : index
    %c0_59 = arith.constant 0 : index
    %c0_60 = arith.constant 0 : index
    %100 = vector.load %arg4[%c1_58, %c0_59, %c0_60] : memref<2x128x64xbf16, #tpu.memory_space<vmem>>, vector<1x128x64xbf16>
    %101 = vector.shape_cast %100 : vector<1x128x64xbf16> to vector<128x64xbf16>
    %102 = arith.extf %101 : vector<128x64xbf16> to vector<128x64xf32>
    %cst_61 = arith.constant dense<0.000000e+00> : vector<8x64xf32>
    %103 = tpu.matmul %99, %102, %cst_61 {dimension_numbers = #tpu.dot_dimension_numbers<[1], [0], [0], [1], [0, 0, 1, 1], [], []>} : vector<8x128xf32>, vector<128x64xf32>, vector<8x64xf32> -> vector<8x64xf32>
    %c9 = arith.constant 9 : index
    %c0_62 = arith.constant 0 : index
    %104 = vector.load %arg5[%c9, %c0_62] : memref<11x256xf32, #tpu.memory_space<vmem>>, vector<1x64xf32>
    %105 = vector.broadcast %104 : vector<1x64xf32> to vector<8x64xf32>
    %106 = arith.addf %103, %105 : vector<8x64xf32>
    %cst_63 = arith.constant 0.000000e+00 : f32
    %107 = vector.broadcast %cst_63 : f32 to vector<8x64xf32>
    %108 = arith.maximumf %106, %107 : vector<8x64xf32>
    %c3_64 = arith.constant 3 : index
    %c0_65 = arith.constant 0 : index
    %c0_66 = arith.constant 0 : index
    %109 = vector.load %arg1[%c3_64, %c0_65, %c0_66] : memref<4x64x256xbf16, #tpu.memory_space<vmem>>, vector<1x64x256xbf16>
    %110 = vector.shape_cast %109 : vector<1x64x256xbf16> to vector<64x256xbf16>
    %111 = arith.extf %110 : vector<64x256xbf16> to vector<64x256xf32>
    %cst_67 = arith.constant dense<0.000000e+00> : vector<8x256xf32>
    %112 = tpu.matmul %108, %111, %cst_67 {dimension_numbers = #tpu.dot_dimension_numbers<[1], [0], [0], [1], [0, 0, 1, 1], [], []>} : vector<8x64xf32>, vector<64x256xf32>, vector<8x256xf32> -> vector<8x256xf32>
    %c10 = arith.constant 10 : index
    %c0_68 = arith.constant 0 : index
    %113 = vector.load %arg5[%c10, %c0_68] : memref<11x256xf32, #tpu.memory_space<vmem>>, vector<1x256xf32>
    %114 = vector.broadcast %113 : vector<1x256xf32> to vector<8x256xf32>
    %115 = arith.addf %112, %114 : vector<8x256xf32>
    %c128_i32_69 = arith.constant 128 : i32
    %116 = vector.broadcast %c128_i32_69 : i32 to vector<8x256xi32>
    %117 = arith.cmpi slt, %3, %116 : vector<8x256xi32>
    %cst_70 = arith.constant 0.000000e+00 : f32
    %118 = vector.broadcast %cst_70 : f32 to vector<8x256xf32>
    %119 = arith.maximumf %115, %118 : vector<8x256xf32>
    %120 = math.absf %115 : vector<8x256xf32>
    %cst_71 = arith.constant 0.000000e+00 : f32
    %121 = vector.broadcast %cst_71 : f32 to vector<8x256xf32>
    %122 = arith.subf %121, %120 : vector<8x256xf32>
    %123 = math.exp %122 : vector<8x256xf32>
    %124 = math.log1p %123 : vector<8x256xf32>
    %125 = arith.addf %119, %124 : vector<8x256xf32>
    %126 = arith.select %117, %115, %125 : vector<8x256xi1>, vector<8x256xf32>
    %c0_72 = arith.constant 0 : index
    %c256 = arith.constant 256 : index
    %127 = vector.load %arg6[%c0_72, %c256] : memref<8x512xf32, #tpu.memory_space<vmem>>, vector<8x256xf32>
    tpu.vector_store %arg6[%c0_72, %c256], %126 {strides = array<i32>} : memref<8x512xf32, #tpu.memory_space<vmem>>, vector<8x256xf32>,
    return
  }
}

</mosaic_0001>

<bundles_post_ra>
// kernel: tpu_custom_call.1
= control target key start
LH: loop header
LB: loop body
LE: loop exit
PB: predicated region body
PF: predicated region fallthrough
CT: control target
= control target key end

     0   :  { %11 = vsyncpa [#allocation3], 0  ;;  %s3111_s0 = inlined_call_operand.vmem [shape: f32[8,256], index: 0, kind: input, shape index: {}]   ;;  %s3112_s1 = inlined_call_operand.hbm [shape: bf16[4,64,256], index: 1, kind: input, shape index: {}]   ;;  %s3113_s2 = inlined_call_operand.hbm [shape: bf16[3,256,256], index: 2, kind: input, shape index: {}]   ;;  %s3114_s3 = inlined_call_operand.hbm [shape: bf16[2,256,128], index: 3, kind: input, shape index: {}]   ;;  %s3115_s4 = inlined_call_operand.vmem [shape: bf16[2,128,64], index: 4, kind: input, shape index: {}]   ;;  %s3116_s5 = inlined_call_operand.vmem [shape: f32[11,256], index: 5, kind: input, shape index: {}]   ;;  %s3117_s6 = inlined_call_operand.hbm [shape: f32[8,512], index: 6, kind: output, shape index: {}]  }
   0x1   :  { %12 = vsyncpa [#allocation6], 0 }
   0x2   :  { %13 = vsyncpa [#allocation4], 0  ;;  %s2877_s21 = smov [#allocation5]   ;;  %s2878_s23 = smov [#allocation2]  }
   0x3   :  { %s33_s22 = sshll.u32 %s2877_s21, 4  ;;  %s21_s24 = sshll.u32 %s2878_s23, 4  ;;  %s34_s22 = int_to_ptr.vmem [resolvable:$true] %s33_s22  ;;  %s2923_s24 = int_to_ptr.vmem [resolvable:$true] %s21_s24 }
   0x4   :  { %s2783_s27 = scalar_lea.hbm %s3113_s2, 12288 }
   0x5   :  { %p2784_p0 = scmp.ne.s32.totalorder %s3113_s2, %s2783_s27  ;;  %p2787_p1 = scmp.lt.u32.totalorder %s2783_s27, %s3113_s2 }
   0x7   :  { %p2789_p2 = pnand %p2787_p1, %p2784_p0 }
   0x9   :  { %2792 = shalt.err (!%p2789_p2)
}
   0xa   :  { %s2793_s8 = scalar_lea.vmem %s34_s22, 12288  ;;  %p2798_p4 = scmp.lt.s32.totalorder %s34_s22, %s34_s22 }
   0xb   :  { %p2794_p3 = scmp.ne.s32.totalorder %s34_s22, %s2793_s8  ;;  %p2799_p5 = scmp.lt.s32.totalorder %s2793_s8, %s2793_s8 }
   0xd   :  { %p2800_p6 = por %p2799_p5, %p2798_p4 }
   0xf   :  { %p2801_p7 = pnand %p2800_p6, %p2794_p3 }
  0x11   :  { %2804 = shalt.err (!%p2801_p7)
}
  0x12   :  { %s2879_s9 = smov 128   ;;  %s2880_s10 = smov 8  }
  0x13   :  { %39 = dma.hbm_to_vmem [thread:$0]  %s3113_s2, 12288, %s34_s22, [#allocation6], %s2879_s9, %s2879_s9, %s2880_s10  }
  0x14   :  { %s2805_s15 = scalar_lea.hbm %s3112_s1, 4096 }
  0x15   :  { %p2806_p8 = scmp.ne.s32.totalorder %s3112_s1, %s2805_s15  ;;  %p2809_p9 = scmp.lt.u32.totalorder %s2805_s15, %s3112_s1 }
  0x17   :  { %p2811_p10 = pnand %p2809_p9, %p2806_p8 }
  0x19   :  { %2814 = shalt.err (!%p2811_p10)
}
  0x1a   :  { %s2815_s20 = scalar_lea.vmem %s2923_s24, 4096  ;;  %p2820_p12 = scmp.lt.s32.totalorder %s2923_s24, %s2923_s24 }
  0x1b   :  { %p2816_p11 = scmp.ne.s32.totalorder %s2923_s24, %s2815_s20  ;;  %p2821_p13 = scmp.lt.s32.totalorder %s2815_s20, %s2815_s20 }
  0x1d   :  { %p2822_p0 = por %p2821_p13, %p2820_p12 }
  0x1f   :  { %p2823_p1 = pnand %p2822_p0, %p2816_p11 }
  0x21   :  { %2826 = shalt.err (!%p2823_p1)
}
  0x22   :  { %27 = dma.hbm_to_vmem [thread:$0]  %s3112_s1, 4096, %s2923_s24, [#allocation3], %s2879_s9, %s2879_s9, %s2880_s10  }
  0x23   :  { %s2881_s22 = smov [#allocation7]   ;;  %s2827_s27 = scalar_lea.hbm %s3114_s3, 4096 }
  0x24   :  { %s45_s23 = sshll.u32 %s2881_s22, 4  ;;  %p2828_p2 = scmp.ne.s32.totalorder %s3114_s3, %s2827_s27  ;;  %s46_s23 = int_to_ptr.vmem [resolvable:$true] %s45_s23 }
  0x25   :  { %p2831_p3 = scmp.lt.u32.totalorder %s2827_s27, %s3114_s3 }
  0x27   :  { %p2833_p4 = pnand %p2831_p3, %p2828_p2 }
  0x29   :  { %2836 = shalt.err (!%p2833_p4)
}
  0x2a   :  { %s2837_s8 = scalar_lea.vmem %s46_s23, 4096  ;;  %p2842_p6 = scmp.lt.s32.totalorder %s46_s23, %s46_s23 }
  0x2b   :  { %p2838_p5 = scmp.ne.s32.totalorder %s46_s23, %s2837_s8  ;;  %p2843_p7 = scmp.lt.s32.totalorder %s2837_s8, %s2837_s8 }
  0x2d   :  { %p2844_p8 = por %p2843_p7, %p2842_p6 }
  0x2f   :  { %p2845_p9 = pnand %p2844_p8, %p2838_p5 }
  0x31   :  { %2848 = shalt.err (!%p2845_p9)
}
  0x32   :  { %s2882_s1 = smov 64   ;;  %s2883_s24 = smov 4  }
  0x33   :  { %51 = dma.hbm_to_vmem [thread:$0]  %s3114_s3, 4096, %s46_s23, [#allocation6], %s2882_s1, %s2882_s1, %s2883_s24  }
  0x34   :  { %2871 = dma.done.wait [#allocation3], 4096  }
  0x35   :  { %2872 = vsyncadd [#allocation3], 4294963200 }
  0x36   :  { %2873 = dma.done.wait [#allocation6], 16384  }
  0x37   :  { %2874 = vsyncadd [#allocation6], 4294950912  ;;  %v2884_v0 = vmov 0.0   ;;  %v2583_v1 = vld [vmem:[#allocation2 + $0x4] ss:$8 sps:$4 sm:$0xff]   ;;  %vm106_vm0 = vcmask 523264   ;;  %v96_v55 = vlaneseq }
  0x38   :  { %174 = vmatprep.mubr.f32.mxu0 %v2884_v0  ;;  %v2585_v2 = vld [vmem:[#allocation2] ss:$8 sps:$4 sm:$0xff]   ;;  %2077 = vmatprep.subr.bf16.mxu0 %v2583_v1  ;;  %v2586_v3 = vld [vmem:[#allocation2 + $0x14] ss:$8 sps:$4 sm:$0xff]   ;;  %v2588_v4 = vld [vmem:[#allocation2 + $0x10] ss:$8 sps:$4 sm:$0xff]  }
  0x39   :  { %2079 = vmatpush1.bf16.msra.mxu0 %v2585_v2  ;;  %v2589_v5 = vld [vmem:[#allocation2 + $0x24] ss:$8 sps:$4 sm:$0xff]   ;;  %v2591_v6 = vld [vmem:[#allocation2 + $0x20] ss:$8 sps:$4 sm:$0xff]   ;;  %v2598_v9 = vld [vmem:[#allocation5 + $0x14] ss:$8 sps:$4 sm:$0xff]  }
  0x3a   :  { %2081 = vmatprep.subr.bf16.mxu0 %v2586_v3  ;;  %v2595_v7 = vld [vmem:[#allocation5 + $0x4] ss:$8 sps:$4 sm:$0xff]   ;;  %v2597_v8 = vld [vmem:[#allocation5] ss:$8 sps:$4 sm:$0xff]   ;;  %v2592_v10 = vld [vmem:[#allocation2 + $0x34] ss:$8 sps:$4 sm:$0xff]  }
  0x3b   :  { %2093 = vmatprep.subr.bf16.mxu1 %v2595_v7  ;;  %v2600_v11 = vld [vmem:[#allocation5 + $0x10] ss:$8 sps:$4 sm:$0xff]   ;;  %v2601_v12 = vld [vmem:[#allocation5 + $0x24] ss:$8 sps:$4 sm:$0xff]   ;;  %v2603_v14 = vld [vmem:[#allocation5 + $0x20] ss:$8 sps:$4 sm:$0xff]  }
  0x3c   :  { %2095 = vmatpush1.bf16.msra.mxu1 %v2597_v8  ;;  %v2594_v13 = vld [vmem:[#allocation2 + $0x30] ss:$8 sps:$4 sm:$0xff]   ;;  %v2604_v15 = vld [vmem:[#allocation5 + $0x34] ss:$8 sps:$4 sm:$0xff]   ;;  %v65_v16 = vld [vmem:[%s3111_s0] sm:$0xff]  ;;  %v97_v56 = vshrl.u32 %v96_v55, 7 }
  0x3d   :  { %2083 = vmatpush1.bf16.msra.mxu0 %v2588_v4  ;;  %2097 = vmatprep.subr.bf16.mxu1 %v2598_v9  ;;  %v2606_v17 = vld [vmem:[#allocation5 + $0x30] ss:$8 sps:$4 sm:$0xff]   ;;  %v2607_v18 = vld [vmem:[#allocation5 + $0x44] ss:$8 sps:$4 sm:$0xff]   ;;  %v2609_v19 = vld [vmem:[#allocation5 + $0x40] ss:$8 sps:$4 sm:$0xff]  }
  0x3e   :  { %2085 = vmatprep.subr.bf16.mxu0 %v2589_v5  ;;  %v2610_v20 = vld [vmem:[#allocation5 + $0x54] ss:$8 sps:$4 sm:$0xff]   ;;  %v2612_v21 = vld [vmem:[#allocation5 + $0x50] ss:$8 sps:$4 sm:$0xff]   ;;  %v2613_v22 = vld [vmem:[#allocation5 + $0x64] ss:$8 sps:$4 sm:$0xff]  }
  0x3f   :  { %v2615_v23 = vld [vmem:[#allocation5 + $0x60] ss:$8 sps:$4 sm:$0xff]   ;;  %v2616_v24 = vld [vmem:[#allocation5 + $0x74] ss:$8 sps:$4 sm:$0xff]   ;;  %v2618_v25 = vld [vmem:[#allocation5 + $0x70] ss:$8 sps:$4 sm:$0xff]  }
  0x40   :  { %2099 = vmatpush1.bf16.msra.mxu1 %v2600_v11  ;;  %v2619_v26 = vld [vmem:[#allocation5 + $0x84] ss:$8 sps:$4 sm:$0xff]   ;;  %v2621_v27 = vld [vmem:[#allocation5 + $0x80] ss:$8 sps:$4 sm:$0xff]   ;;  %v2622_v28 = vld [vmem:[#allocation5 + $0x94] ss:$8 sps:$4 sm:$0xff]  }
  0x41   :  { %2087 = vmatpush1.bf16.msra.mxu0 %v2591_v6  ;;  %2101 = vmatprep.subr.bf16.mxu1 %v2601_v12  ;;  %v2624_v29 = vld [vmem:[#allocation5 + $0x90] ss:$8 sps:$4 sm:$0xff]   ;;  %v2625_v30 = vld [vmem:[#allocation5 + $0xa4] ss:$8 sps:$4 sm:$0xff]   ;;  %v2627_v31 = vld [vmem:[#allocation5 + $0xa0] ss:$8 sps:$4 sm:$0xff]  }
  0x42   :  { %2089 = vmatprep.subr.bf16.mxu0 %v2592_v10  ;;  %v2628_v32 = vld [vmem:[#allocation5 + $0xb4] ss:$8 sps:$4 sm:$0xff]   ;;  %v2630_v33 = vld [vmem:[#allocation5 + $0xb0] ss:$8 sps:$4 sm:$0xff]   ;;  %v2631_v34 = vld [vmem:[#allocation5 + $0xc4] ss:$8 sps:$4 sm:$0xff]  }
  0x43   :  { %v2633_v35 = vld [vmem:[#allocation5 + $0xc0] ss:$8 sps:$4 sm:$0xff]   ;;  %v2634_v36 = vld [vmem:[#allocation5 + $0xd4] ss:$8 sps:$4 sm:$0xff]   ;;  %v2636_v37 = vld [vmem:[#allocation5 + $0xd0] ss:$8 sps:$4 sm:$0xff]  }
  0x44   :  { %2103 = vmatpush1.bf16.msra.mxu1 %v2603_v14  ;;  %v2637_v38 = vld [vmem:[#allocation5 + $0xe4] ss:$8 sps:$4 sm:$0xff]   ;;  %v2639_v39 = vld [vmem:[#allocation5 + $0xe0] ss:$8 sps:$4 sm:$0xff]   ;;  %v2640_v40 = vld [vmem:[#allocation5 + $0xf4] ss:$8 sps:$4 sm:$0xff]  }
  0x45   :  { %2091 = vmatpush1.bf16.msra.mxu0 %v2594_v13  ;;  %2105 = vmatprep.subr.bf16.mxu1 %v2604_v15  ;;  %v2642_v41 = vld [vmem:[#allocation5 + $0xf0] ss:$8 sps:$4 sm:$0xff]   ;;  %v1864_v42 = vld [vmem:[#allocation7 + $0x40] sm:$0xff]   ;;  %v1865_v44 = vld [vmem:[#allocation7 + $0x48] sm:$0xff]   ;;  %v2971_v57 = vsub.s32 0, %v97_v56  ;;  %v2976_v59 = vsub.s32 1, %v97_v56 }
  0x46   :  { %v1666_v43 = vld [vmem:[#allocation7] sm:$0xff]   ;;  %2157 = vmatprep.subr.bf16.mxu0 %v1864_v42  ;;  %v1857_v45 = vld [vmem:[#allocation7 + $0x8] sm:$0xff]   ;;  %v1866_v46 = vld [vmem:[#allocation7 + $0x50] sm:$0xff]   ;;  %v2885_v8 = vmov 0.0|0.0   ;;  %vm2886_vm1 = vmmov 0  }
  0x47   :  { %v1858_v47 = vld [vmem:[#allocation7 + $0x10] sm:$0xff]   ;;  %v1867_v48 = vld [vmem:[#allocation7 + $0x58] sm:$0xff]   ;;  %v1868_v50 = vld [vmem:[#allocation7 + $0x60] sm:$0xff]  }
  0x48   :  { %1639 = vmatmul.mubr.msk.f32.vlgmr.msra.gmra.mrb[0].mxu0 %vm106_vm0, %v65_v16  ;;  %2107 = vmatpush1.bf16.msra.mxu1 %v2606_v17  ;;  %v1859_v49 = vld [vmem:[#allocation7 + $0x18] sm:$0xff]   ;;  %v1860_v51 = vld [vmem:[#allocation7 + $0x20] sm:$0xff]   ;;  %v1869_v52 = vld [vmem:[#allocation7 + $0x68] sm:$0xff]  }
  0x49   :  { %2109 = vmatprep.subr.bf16.mxu1 %v2607_v18  ;;  %2159 = vmatpush3.bf16.msra.mxu0 %v1666_v43  ;;  %v1861_v53 = vld [vmem:[#allocation7 + $0x28] sm:$0xff]   ;;  %v1870_v54 = vld [vmem:[#allocation7 + $0x70] sm:$0xff]   ;;  %v1871_v6 = vld [vmem:[#allocation7 + $0x78] sm:$0xff]  }
  0x4a   :  { %2161 = vmatprep.subr.bf16.mxu0 %v1865_v44  ;;  %v94_v58 = vld [vmem:[%s3116_s5] ss:$8 sm:$0x3]  ;;  %v1862_v5 = vld [vmem:[#allocation7 + $0x30] sm:$0xff]   ;;  %v1863_v7 = vld [vmem:[#allocation7 + $0x38] sm:$0xff]  }
  0x4b   :  { %v99_v60 = vrot.slane %v94_v58, %v2971_v57  ;;  %v103_v61 = vrot.slane %v94_v58, %v2976_v59  ;;  %v1640_v9 = vld [vmem:[%s3116_s5 + $0x1] ss:$8 sm:$0x3]  ;;  %v2670_v55 = vld [vmem:[#allocation5 + $0x114] ss:$8 sps:$4 sm:$0xff]  }
  0x4c   :  { %2111 = vmatpush1.bf16.msra.mxu1 %v2609_v19  ;;  %v285_v10 = vrot.slane %v1640_v9, %v2971_v57  ;;  %v289_v11 = vrot.slane %v1640_v9, %v2976_v59  ;;  %v1730_v18 = vld [vmem:[%s3115_s4] sm:$0xff]   ;;  %v1872_v19 = vld [vmem:[%s3115_s4 + $0x8] sm:$0xff]   ;;  %v2672_v56 = vld [vmem:[#allocation5 + $0x110] ss:$8 sps:$4 sm:$0xff]  }
  0x4d   :  { %2113 = vmatprep.subr.bf16.mxu1 %v2610_v20  ;;  %2163 = vmatpush3.bf16.msra.mxu0 %v1857_v45  ;;  %v1873_v20 = vld [vmem:[%s3115_s4 + $0x10] sm:$0xff]   ;;  %v2655_v45 = vld [vmem:[#allocation2 + $0x44] ss:$8 sps:$4 sm:$0xff]  }
  0x4e   :  { %2165 = vmatprep.subr.bf16.mxu0 %v1866_v46  ;;  %v2657_v46 = vld [vmem:[#allocation2 + $0x40] ss:$8 sps:$4 sm:$0xff]   ;;  %v2673_v58 = vld [vmem:[#allocation5 + $0x124] ss:$8 sps:$4 sm:$0xff]  }
  0x4f   :  { %v2691_v9 = vld [vmem:[#allocation5 + $0x184] ss:$8 sps:$4 sm:$0xff]  }
  0x50   :  { %2115 = vmatpush1.bf16.msra.mxu1 %v2612_v21  ;;  %v1874_v21 = vld [vmem:[%s3115_s4 + $0x18] sm:$0xff]  }
  0x51   :  { %2117 = vmatprep.subr.bf16.mxu1 %v2613_v22  ;;  %2167 = vmatpush3.bf16.msra.mxu0 %v1858_v47  ;;  %v1875_v22 = vld [vmem:[%s3115_s4 + $0x20] sm:$0xff]   ;;  %v2658_v47 = vld [vmem:[#allocation2 + $0x54] ss:$8 sps:$4 sm:$0xff]  }
  0x52   :  { %2169 = vmatprep.subr.bf16.mxu0 %v1867_v48  ;;  %v2660_v48 = vld [vmem:[#allocation2 + $0x50] ss:$8 sps:$4 sm:$0xff]  }
  0x54   :  { %2119 = vmatpush1.bf16.msra.mxu1 %v2615_v23  ;;  %v1876_v23 = vld [vmem:[%s3115_s4 + $0x28] sm:$0xff]  }
  0x55   :  { %2121 = vmatprep.subr.bf16.mxu1 %v2616_v24  ;;  %2171 = vmatpush3.bf16.msra.mxu0 %v1859_v49  ;;  %v1877_v24 = vld [vmem:[%s3115_s4 + $0x30] sm:$0xff]   ;;  %v2661_v49 = vld [vmem:[#allocation2 + $0x64] ss:$8 sps:$4 sm:$0xff]  }
  0x56   :  { %2173 = vmatprep.subr.bf16.mxu0 %v1868_v50  ;;  %v2663_v50 = vld [vmem:[#allocation2 + $0x60] ss:$8 sps:$4 sm:$0xff]  }
  0x58   :  { %2123 = vmatpush1.bf16.msra.mxu1 %v2618_v25  ;;  %v1878_v25 = vld [vmem:[%s3115_s4 + $0x38] sm:$0xff]  }
  0x59   :  { %2125 = vmatprep.subr.bf16.mxu1 %v2619_v26  ;;  %2175 = vmatpush3.bf16.msra.mxu0 %v1860_v51  ;;  %v2643_v26 = vld [vmem:[#allocation2 + $0x84] ss:$8 sps:$4 sm:$0xff]   ;;  %v2664_v51 = vld [vmem:[#allocation2 + $0x74] ss:$8 sps:$4 sm:$0xff]  }
  0x5a   :  { %2177 = vmatprep.subr.bf16.mxu0 %v1869_v52  ;;  %v2666_v52 = vld [vmem:[#allocation2 + $0x70] ss:$8 sps:$4 sm:$0xff]  }
  0x5c   :  { %2127 = vmatpush1.bf16.msra.mxu1 %v2621_v27  ;;  %v2645_v27 = vld [vmem:[#allocation2 + $0x80] ss:$8 sps:$4 sm:$0xff]  }
  0x5d   :  { %2129 = vmatprep.subr.bf16.mxu1 %v2622_v28  ;;  %2179 = vmatpush3.bf16.msra.mxu0 %v1861_v53  ;;  %v2646_v28 = vld [vmem:[#allocation2 + $0x94] ss:$8 sps:$4 sm:$0xff]   ;;  %v2667_v53 = vld [vmem:[#allocation5 + $0x104] ss:$8 sps:$4 sm:$0xff]  }
  0x5e   :  { %2181 = vmatprep.subr.bf16.mxu0 %v1870_v54  ;;  %v2669_v54 = vld [vmem:[#allocation5 + $0x100] ss:$8 sps:$4 sm:$0xff]  }
  0x60   :  { %2131 = vmatpush1.bf16.msra.mxu1 %v2624_v29  ;;  %v2648_v29 = vld [vmem:[#allocation2 + $0x90] ss:$8 sps:$4 sm:$0xff]  }
  0x61   :  { %2133 = vmatprep.subr.bf16.mxu1 %v2625_v30  ;;  %2183 = vmatpush3.bf16.msra.mxu0 %v1862_v5  ;;  %v2649_v30 = vld [vmem:[#allocation2 + $0xa4] ss:$8 sps:$4 sm:$0xff]   ;;  %v2687_v5 = vld [vmem:[#allocation5 + $0x160] ss:$8 sps:$4 sm:$0xff]  }
  0x62   :  { %2185 = vmatprep.subr.bf16.mxu0 %v1871_v6  ;;  %v2688_v6 = vld [vmem:[#allocation5 + $0x174] ss:$8 sps:$4 sm:$0xff]  }
  0x64   :  { %2135 = vmatpush1.bf16.msra.mxu1 %v2627_v31  ;;  %v2651_v31 = vld [vmem:[#allocation2 + $0xa0] ss:$8 sps:$4 sm:$0xff]  }
  0x65   :  { %2137 = vmatprep.subr.bf16.mxu1 %v2628_v32  ;;  %2187 = vmatpush3.bf16.msra.mxu0 %v1863_v7  ;;  %v2690_v7 = vld [vmem:[#allocation5 + $0x170] ss:$8 sps:$4 sm:$0xff]  }
  0x66   :  { %2188 = vmatprep.subr.bf16.mxu0 %v2885_v8 }
  0x68   :  { %2139 = vmatpush1.bf16.msra.mxu1 %v2630_v33  ;;  %v429_v33 = vld [vmem:[%s3116_s5 + $0x2] ss:$0 sm:$0xff] }
  0x69   :  { %2141 = vmatprep.subr.bf16.mxu1 %v2631_v34 }
  0x6c   :  { %2143 = vmatpush1.bf16.msra.mxu1 %v2633_v35 }
  0x6d   :  { %2145 = vmatprep.subr.bf16.mxu1 %v2634_v36 }
  0x70   :  { %2147 = vmatpush1.bf16.msra.mxu1 %v2636_v37 }
  0x71   :  { %2149 = vmatprep.subr.bf16.mxu1 %v2637_v38  ;;  %v2652_v38 = vld [vmem:[#allocation2 + $0xb4] ss:$8 sps:$4 sm:$0xff]  }
  0x74   :  { %2151 = vmatpush1.bf16.msra.mxu1 %v2639_v39  ;;  %v2654_v39 = vld [vmem:[#allocation2 + $0xb0] ss:$8 sps:$4 sm:$0xff]  }
  0x75   :  { %2153 = vmatprep.subr.bf16.mxu1 %v2640_v40  ;;  %v533_v40 = vld [vmem:[%s3116_s5 + $0x3] ss:$0 sm:$0xff] }
  0x78   :  { %2155 = vmatpush1.bf16.msra.mxu1 %v2642_v41 }
  0x79   :  { %2213 = vmatprep.subr.bf16.mxu1 %v2643_v26 }
 0x11b   :  { %v176_v62 = vpop.f32.mrb[0].mxu0 }
 0x11c   :  { %v177_v63 = vadd.f32 %v176_v62, %v99_v60  ;;  %v178_v1 = vpop.f32.mrb[1].mxu0  ;;  %v2675_v60 = vld [vmem:[#allocation5 + $0x120] ss:$8 sps:$4 sm:$0xff]   ;;  %v2678_v62 = vld [vmem:[#allocation5 + $0x130] ss:$8 sps:$4 sm:$0xff]  }
 0x11d   :  { %v179_v2 = vadd.f32 %v178_v1, %v103_v61  ;;  %v2676_v61 = vld [vmem:[#allocation5 + $0x134] ss:$8 sps:$4 sm:$0xff]   ;;  %v2681_v1 = vld [vmem:[#allocation5 + $0x140] ss:$8 sps:$4 sm:$0xff]  }
 0x11e   :  { %v181_v4 = vmax.f32 %v177_v63, 0.0  ;;  %v2679_v63 = vld [vmem:[#allocation5 + $0x144] ss:$8 sps:$4 sm:$0xff]  }
 0x11f   :  { %v182_v3 = vmax.f32 %v179_v2, 0.0  ;;  %v2682_v2 = vld [vmem:[#allocation5 + $0x154] ss:$8 sps:$4 sm:$0xff]  }
 0x121   :  { %356 = vmatprep.mubr.f32.mxu1 %v182_v3  ;;  %v2684_v3 = vld [vmem:[#allocation5 + $0x150] ss:$8 sps:$4 sm:$0xff]  }
 0x122   :  { %357 = vmatmul.mubr.f32.vlgmr.msra.gmra.mrb[0].mxu1 %v181_v4  ;;  %v2685_v4 = vld [vmem:[#allocation5 + $0x164] ss:$8 sps:$4 sm:$0xff]  }
 0x123   :  { %710 = vmatprep.mubr.f32.mxu1 %v2884_v0  ;;  %2215 = vmatpush1.bf16.msra.mxu1 %v2645_v27 }
 0x124   :  { %2217 = vmatprep.subr.bf16.mxu1 %v2646_v28 }
 0x127   :  { %2219 = vmatpush1.bf16.msra.mxu1 %v2648_v29 }
 0x128   :  { %2221 = vmatprep.subr.bf16.mxu1 %v2649_v30 }
 0x12b   :  { %2223 = vmatpush1.bf16.msra.mxu1 %v2651_v31 }
 0x12c   :  { %2225 = vmatprep.subr.bf16.mxu1 %v2652_v38 }
 0x12f   :  { %2227 = vmatpush1.bf16.msra.mxu1 %v2654_v39 }
 0x130   :  { %2245 = vmatprep.subr.bf16.mxu1 %v2667_v53  ;;  %v2721_v53 = vld [vmem:[#allocation5 + $0x224] ss:$8 sps:$4 sm:$0xff]  }
 0x1f5   :  { %v358_v12 = vpop.f32.mrb[0].mxu1 }
 0x1f6   :  { %v359_v13 = vadd.f32 %v358_v12, %v285_v10  ;;  %v360_v14 = vpop.f32.mrb[1].mxu1  ;;  %v2693_v10 = vld [vmem:[#allocation5 + $0x180] ss:$8 sps:$4 sm:$0xff]   ;;  %v2696_v12 = vld [vmem:[#allocation5 + $0x190] ss:$8 sps:$4 sm:$0xff]  }
 0x1f7   :  { %v361_v15 = vadd.f32 %v360_v14, %v289_v11  ;;  %v2694_v11 = vld [vmem:[#allocation5 + $0x194] ss:$8 sps:$4 sm:$0xff]   ;;  %v2699_v14 = vld [vmem:[#allocation5 + $0x1a0] ss:$8 sps:$4 sm:$0xff]  }
 0x1f8   :  { %v363_v17 = vmax.f32 %v359_v13, 0.0  ;;  %v2697_v13 = vld [vmem:[#allocation5 + $0x1a4] ss:$8 sps:$4 sm:$0xff]  }
 0x1f9   :  { %v364_v16 = vmax.f32 %v361_v15, 0.0  ;;  %v2700_v15 = vld [vmem:[#allocation5 + $0x1b4] ss:$8 sps:$4 sm:$0xff]  }
 0x1fb   :  { %494 = vmatprep.mubr.f32.mxu0 %v364_v16  ;;  %v2702_v16 = vld [vmem:[#allocation5 + $0x1b0] ss:$8 sps:$4 sm:$0xff]  }
 0x1fc   :  { %495 = vmatmul.mubr.f32.vlgmr.msra.gmra.mrb[2].mxu0 %v363_v17  ;;  %v2703_v17 = vld [vmem:[#allocation5 + $0x1c4] ss:$8 sps:$4 sm:$0xff]  }
 0x1fd   :  { %2190 = vmatpush3.bf16.msra.mxu0 %v1730_v18  ;;  %2038 = vmatprep.mubr.msk.f32.mxu0 %vm2886_vm1, %v2884_v0  ;;  %v2705_v18 = vld [vmem:[#allocation5 + $0x1c0] ss:$8 sps:$4 sm:$0xff]  }
 0x1fe   :  { %2191 = vmatprep.subr.bf16.mxu0 %v2885_v8 }
 0x201   :  { %2193 = vmatpush3.bf16.msra.mxu0 %v1872_v19  ;;  %v2706_v19 = vld [vmem:[#allocation5 + $0x1d4] ss:$8 sps:$4 sm:$0xff]  }
 0x202   :  { %2194 = vmatprep.subr.bf16.mxu0 %v2885_v8 }
 0x205   :  { %2196 = vmatpush3.bf16.msra.mxu0 %v1873_v20  ;;  %v2708_v20 = vld [vmem:[#allocation5 + $0x1d0] ss:$8 sps:$4 sm:$0xff]  }
 0x206   :  { %2197 = vmatprep.subr.bf16.mxu0 %v2885_v8 }
 0x209   :  { %2199 = vmatpush3.bf16.msra.mxu0 %v1874_v21  ;;  %v2709_v21 = vld [vmem:[#allocation5 + $0x1e4] ss:$8 sps:$4 sm:$0xff]  }
 0x20a   :  { %2200 = vmatprep.subr.bf16.mxu0 %v2885_v8 }
 0x20d   :  { %2202 = vmatpush3.bf16.msra.mxu0 %v1875_v22  ;;  %v2711_v22 = vld [vmem:[#allocation5 + $0x1e0] ss:$8 sps:$4 sm:$0xff]  }
 0x20e   :  { %2203 = vmatprep.subr.bf16.mxu0 %v2885_v8 }
 0x211   :  { %2205 = vmatpush3.bf16.msra.mxu0 %v1876_v23  ;;  %v1641_v23 = vld [vmem:[%s3116_s5 + $0x4] ss:$8 sm:$0x3] }
 0x212   :  { %2206 = vmatprep.subr.bf16.mxu0 %v2885_v8 }
 0x215   :  { %2208 = vmatpush3.bf16.msra.mxu0 %v1877_v24  ;;  %v636_v24 = vrot.slane %v1641_v23, %v2971_v57 }
 0x216   :  { %2209 = vmatprep.subr.bf16.mxu0 %v2885_v8 }
 0x219   :  { %2211 = vmatpush3.bf16.msra.mxu0 %v1878_v25  ;;  %v640_v25 = vrot.slane %v1641_v23, %v2976_v59 }
 0x21a   :  { %2229 = vmatprep.subr.bf16.mxu0 %v2655_v45 }
 0x2cf   :  { %v1934_v32 = vpop.f32.mrb[2].mxu0 }
 0x2d0   :  { %v1935_v34 = vpop.f32.mrb[3].mxu0 }
 0x2d1   :  { %v1936_v35 = vadd.f32 %v1935_v34, %v1934_v32 }
 0x2d3   :  { %v497_v36 = vadd.f32 %v1936_v35, %v429_v33 }
 0x2d5   :  { %v500_v37 = vmax.f32 %v497_v36, 0.0 }
 0x2d7   :  { %2039 = vmatmul.mubr.f32.vlgmr.msra.gmra.mrb[4].mxu0 %v500_v37 }
 0x2d8   :  { %860 = vmatprep.mubr.f32.mxu0 %v2884_v0  ;;  %2231 = vmatpush1.bf16.msra.mxu0 %v2657_v46 }
 0x2d9   :  { %2233 = vmatprep.subr.bf16.mxu0 %v2658_v47  ;;  %v2712_v47 = vld [vmem:[#allocation5 + $0x1f4] ss:$8 sps:$4 sm:$0xff]  }
 0x2dc   :  { %2235 = vmatpush1.bf16.msra.mxu0 %v2660_v48  ;;  %v2714_v48 = vld [vmem:[#allocation5 + $0x1f0] ss:$8 sps:$4 sm:$0xff]  }
 0x2dd   :  { %2237 = vmatprep.subr.bf16.mxu0 %v2661_v49  ;;  %v2715_v49 = vld [vmem:[#allocation5 + $0x204] ss:$8 sps:$4 sm:$0xff]  }
 0x2e0   :  { %2239 = vmatpush1.bf16.msra.mxu0 %v2663_v50  ;;  %v2717_v50 = vld [vmem:[#allocation5 + $0x200] ss:$8 sps:$4 sm:$0xff]  }
 0x2e1   :  { %2241 = vmatprep.subr.bf16.mxu0 %v2664_v51  ;;  %v2718_v51 = vld [vmem:[#allocation5 + $0x214] ss:$8 sps:$4 sm:$0xff]  }
 0x2e4   :  { %2243 = vmatpush1.bf16.msra.mxu0 %v2666_v52  ;;  %v2720_v52 = vld [vmem:[#allocation5 + $0x210] ss:$8 sps:$4 sm:$0xff]  }
 0x2e5   :  { %2309 = vmatprep.subr.bf16.mxu0 %v2715_v49 }
 0x3aa   :  { %v600_v41 = vpop.f32.mrb[4].mxu0 }
 0x3ab   :  { %v601_v42 = vadd.f32 %v600_v41, %v533_v40  ;;  %v2040_v43 = vpop.f32.mrb[5].mxu0 }
 0x3ad   :  { %v604_v44 = vmax.f32 %v601_v42, 0.0  ;;  %v66_v42 = vld [vmem:[%s3111_s0 + $0x8] sm:$0xff] }
 0x3af   :  { %1642 = vmatmul.mubr.msk.f32.vlgmr.msra.gmra.mrb[2].mxu1 %vm106_vm0, %v604_v44 }
 0x3b0   :  { %2247 = vmatpush1.bf16.msra.mxu1 %v2669_v54  ;;  %v2723_v54 = vld [vmem:[#allocation5 + $0x220] ss:$8 sps:$4 sm:$0xff]  }
 0x3b1   :  { %2249 = vmatprep.subr.bf16.mxu1 %v2670_v55  ;;  %v2724_v55 = vld [vmem:[#allocation5 + $0x234] ss:$8 sps:$4 sm:$0xff]  }
 0x3b4   :  { %2251 = vmatpush1.bf16.msra.mxu1 %v2672_v56  ;;  %v2726_v56 = vld [vmem:[#allocation5 + $0x230] ss:$8 sps:$4 sm:$0xff]  }
 0x3b5   :  { %2253 = vmatprep.subr.bf16.mxu1 %v2673_v58  ;;  %v2727_v58 = vld [vmem:[#allocation5 + $0x244] ss:$8 sps:$4 sm:$0xff]  }
 0x3b8   :  { %2255 = vmatpush1.bf16.msra.mxu1 %v2675_v60  ;;  %v2729_v60 = vld [vmem:[#allocation5 + $0x240] ss:$8 sps:$4 sm:$0xff]  }
 0x3b9   :  { %2257 = vmatprep.subr.bf16.mxu1 %v2676_v61  ;;  %v2730_v61 = vld [vmem:[#allocation5 + $0x254] ss:$8 sps:$4 sm:$0xff]  }
 0x3bc   :  { %2259 = vmatpush1.bf16.msra.mxu1 %v2678_v62  ;;  %v2732_v62 = vld [vmem:[#allocation5 + $0x250] ss:$8 sps:$4 sm:$0xff]  }
 0x3bd   :  { %2261 = vmatprep.subr.bf16.mxu1 %v2679_v63  ;;  %v2733_v63 = vld [vmem:[#allocation5 + $0x264] ss:$8 sps:$4 sm:$0xff]  }
 0x3c0   :  { %2263 = vmatpush1.bf16.msra.mxu1 %v2681_v1  ;;  %v2735_v1 = vld [vmem:[#allocation5 + $0x260] ss:$8 sps:$4 sm:$0xff]  }
 0x3c1   :  { %2265 = vmatprep.subr.bf16.mxu1 %v2682_v2  ;;  %v2736_v2 = vld [vmem:[#allocation5 + $0x274] ss:$8 sps:$4 sm:$0xff]  }
 0x3c4   :  { %2267 = vmatpush1.bf16.msra.mxu1 %v2684_v3  ;;  %v2738_v3 = vld [vmem:[#allocation5 + $0x270] ss:$8 sps:$4 sm:$0xff]  }
 0x3c5   :  { %2269 = vmatprep.subr.bf16.mxu1 %v2685_v4  ;;  %v2739_v4 = vld [vmem:[#allocation5 + $0x284] ss:$8 sps:$4 sm:$0xff]  }
 0x3c8   :  { %2271 = vmatpush1.bf16.msra.mxu1 %v2687_v5  ;;  %v2741_v5 = vld [vmem:[#allocation5 + $0x280] ss:$8 sps:$4 sm:$0xff]  }
 0x3c9   :  { %2273 = vmatprep.subr.bf16.mxu1 %v2688_v6  ;;  %v2742_v6 = vld [vmem:[#allocation5 + $0x294] ss:$8 sps:$4 sm:$0xff]  }
 0x3cc   :  { %2275 = vmatpush1.bf16.msra.mxu1 %v2690_v7  ;;  %v2744_v7 = vld [vmem:[#allocation5 + $0x290] ss:$8 sps:$4 sm:$0xff]  }
 0x3cd   :  { %2277 = vmatprep.subr.bf16.mxu1 %v2691_v9  ;;  %v2745_v9 = vld [vmem:[#allocation5 + $0x2a4] ss:$8 sps:$4 sm:$0xff]  }
 0x3d0   :  { %2279 = vmatpush1.bf16.msra.mxu1 %v2693_v10  ;;  %v2747_v10 = vld [vmem:[#allocation5 + $0x2a0] ss:$8 sps:$4 sm:$0xff]  }
 0x3d1   :  { %2281 = vmatprep.subr.bf16.mxu1 %v2694_v11  ;;  %v2748_v11 = vld [vmem:[#allocation5 + $0x2b4] ss:$8 sps:$4 sm:$0xff]  }
 0x3d4   :  { %2283 = vmatpush1.bf16.msra.mxu1 %v2696_v12  ;;  %v2750_v12 = vld [vmem:[#allocation5 + $0x2b0] ss:$8 sps:$4 sm:$0xff]  }
 0x3d5   :  { %2285 = vmatprep.subr.bf16.mxu1 %v2697_v13  ;;  %v2751_v13 = vld [vmem:[#allocation5 + $0x2c4] ss:$8 sps:$4 sm:$0xff]  }
 0x3d8   :  { %2287 = vmatpush1.bf16.msra.mxu1 %v2699_v14  ;;  %v2753_v14 = vld [vmem:[#allocation5 + $0x2c0] ss:$8 sps:$4 sm:$0xff]  }
 0x3d9   :  { %2289 = vmatprep.subr.bf16.mxu1 %v2700_v15  ;;  %v2754_v15 = vld [vmem:[#allocation5 + $0x2d4] ss:$8 sps:$4 sm:$0xff]  }
 0x3dc   :  { %2291 = vmatpush1.bf16.msra.mxu1 %v2702_v16  ;;  %v2756_v16 = vld [vmem:[#allocation5 + $0x2d0] ss:$8 sps:$4 sm:$0xff]  }
 0x3dd   :  { %2293 = vmatprep.subr.bf16.mxu1 %v2703_v17  ;;  %v2757_v17 = vld [vmem:[#allocation5 + $0x2e4] ss:$8 sps:$4 sm:$0xff]  }
 0x3e0   :  { %2295 = vmatpush1.bf16.msra.mxu1 %v2705_v18  ;;  %v2759_v18 = vld [vmem:[#allocation5 + $0x2e0] ss:$8 sps:$4 sm:$0xff]  }
 0x3e1   :  { %2297 = vmatprep.subr.bf16.mxu1 %v2706_v19  ;;  %v1643_v19 = vld [vmem:[%s3116_s5 + $0x5] ss:$8 sm:$0x3] }
 0x3e4   :  { %2299 = vmatpush1.bf16.msra.mxu1 %v2708_v20  ;;  %v786_v20 = vrot.slane %v1643_v19, %v2971_v57 }
 0x3e5   :  { %2301 = vmatprep.subr.bf16.mxu1 %v2709_v21  ;;  %v790_v21 = vrot.slane %v1643_v19, %v2976_v59 }
 0x3e8   :  { %2303 = vmatpush1.bf16.msra.mxu1 %v2711_v22 }
 0x3e9   :  { %2305 = vmatprep.subr.bf16.mxu1 %v2712_v47 }
 0x3ec   :  { %2307 = vmatpush1.bf16.msra.mxu1 %v2714_v48 }
 0x482   :  { %v712_v26 = vpop.f32.mrb[2].mxu1 }
 0x483   :  { %v713_v27 = vadd.f32 %v712_v26, %v636_v24  ;;  %v714_v28 = vpop.f32.mrb[3].mxu1 }
 0x484   :  { %v715_v29 = vadd.f32 %v714_v28, %v640_v25  ;;  %v2760_v28 = vld [vmem:[#allocation5 + $0x2f4] ss:$8 sps:$4 sm:$0xff]  }
 0x485   :  { %751 = vst [vmem:[#allocation8] sm:$0xff] %v713_v27 }
 0x486   :  { %v722_v30 = vand.u32 2147483647, %v715_v29  ;;  %v720_v41 = vmax.f32 %v715_v29, 0.0  ;;  %v2762_v29 = vld [vmem:[#allocation5 + $0x2f0] ss:$8 sps:$4 sm:$0xff]  }
 0x488   :  { %v724_v31 = vsub.f32 0.0, %v722_v30  ;;  %v1886_v30 = vld [vmem:[#allocation7 + $0xc0] sm:$0xff]  }
 0x489   :  { %2373 = vmatprep.subr.bf16.mxu1 %v1886_v30 }
 0x48a   :  { %v727_v32 = vmul.f32 1.442695, %v724_v31  ;;  %v1762_v31 = vld [vmem:[#allocation7 + $0x80] sm:$0xff]  }
 0x48c   :  { %2775 = vpow2.f32 %v727_v32  ;;  %v1887_v32 = vld [vmem:[#allocation7 + $0xc8] sm:$0xff]  }
 0x496   :  { %v2776_v33 = vpop.eup %2775 }
 0x497   :  { %v738_v34 = vadd.f32 1.0, %v2776_v33  ;;  %v741_v35 = vmul.f32 -0.5, %v2776_v33  ;;  %v744_v37 = vand.u32 2147483647, %v2776_v33 }
 0x499   :  { %2777 = vlog2.f32 %v738_v34  ;;  %v742_v36 = vadd.f32 1.0, %v741_v35  ;;  %vm745_vm2 = vcmp.lt.f32.partialorder %v744_v37, 0.0004427343  ;;  %v1888_v34 = vld [vmem:[#allocation7 + $0xd0] sm:$0xff]   ;;  %v1881_v37 = vld [vmem:[#allocation7 + $0x98] sm:$0xff]  }
 0x49a   :  { %v1880_v35 = vld [vmem:[#allocation7 + $0x90] sm:$0xff]  }
 0x49b   :  { %v743_v40 = vmul.f32 %v2776_v33, %v742_v36  ;;  %v1879_v33 = vld [vmem:[#allocation7 + $0x88] sm:$0xff]   ;;  %v1889_v36 = vld [vmem:[#allocation7 + $0xd8] sm:$0xff]  }
 0x4a3   :  { %v2778_v38 = vpop.eup %2777 }
 0x4a4   :  { %v740_v39 = vmul.f32 0.6931472, %v2778_v38  ;;  %v1890_v38 = vld [vmem:[#allocation7 + $0xe0] sm:$0xff]  }
 0x4a6   :  { %v746_v43 = vsel %vm745_vm2, %v743_v40, %v740_v39  ;;  %v1882_v39 = vld [vmem:[#allocation7 + $0xa0] sm:$0xff]   ;;  %v1891_v40 = vld [vmem:[#allocation7 + $0xe8] sm:$0xff]  }
 0x4a7   :  { %v748_v44 = vadd.f32 %v746_v43, %v720_v41  ;;  %v1883_v41 = vld [vmem:[#allocation7 + $0xa8] sm:$0xff]  }
 0x4a8   :  { %v1645_v43 = vld [vmem:[%s3116_s5 + $0x6] ss:$8 sm:$0x3] }
 0x4a9   :  { %752 = vst [vmem:[#allocation8 + $0x8] sm:$0xff] %v748_v44  ;;  %v753_v45 = vmul.f32 %v748_v44, %v66_v42  ;;  %v1892_v42 = vld [vmem:[#allocation7 + $0xf0] sm:$0xff]   ;;  %v972_v44 = vrot.slane %v1645_v43, %v2971_v57 }
 0x4ab   :  { %v754_v46 = vadd.f32 %v753_v45, %v713_v27  ;;  %v976_v45 = vrot.slane %v1645_v43, %v2976_v59 }
 0x4ad   :  { %1644 = vmatmul.mubr.msk.f32.vlgmr.msra.gmra.mrb[6].mxu0 %vm106_vm0, %v754_v46 }
 0x4ae   :  { %2311 = vmatpush1.bf16.msra.mxu0 %v2717_v50 }
 0x4af   :  { %2313 = vmatprep.subr.bf16.mxu0 %v2718_v51 }
 0x4b2   :  { %2315 = vmatpush1.bf16.msra.mxu0 %v2720_v52  ;;  %v1884_v52 = vld [vmem:[#allocation7 + $0xb0] sm:$0xff]  }
 0x4b3   :  { %2317 = vmatprep.subr.bf16.mxu0 %v2721_v53  ;;  %v1893_v53 = vld [vmem:[#allocation7 + $0xf8] sm:$0xff]  }
 0x4b6   :  { %2319 = vmatpush1.bf16.msra.mxu0 %v2723_v54  ;;  %v1885_v54 = vld [vmem:[#allocation7 + $0xb8] sm:$0xff]  }
 0x4b7   :  { %2321 = vmatprep.subr.bf16.mxu0 %v2724_v55  ;;  %v1894_v55 = vld [vmem:[%s3115_s4 + $0x40] sm:$0xff]  }
 0x4ba   :  { %2323 = vmatpush1.bf16.msra.mxu0 %v2726_v56  ;;  %v1895_v56 = vld [vmem:[%s3115_s4 + $0x48] sm:$0xff]  }
 0x4bb   :  { %2325 = vmatprep.subr.bf16.mxu0 %v2727_v58  ;;  %v1896_v58 = vld [vmem:[%s3115_s4 + $0x50] sm:$0xff]  }
 0x4be   :  { %2327 = vmatpush1.bf16.msra.mxu0 %v2729_v60  ;;  %v1897_v60 = vld [vmem:[%s3115_s4 + $0x58] sm:$0xff]  }
 0x4bf   :  { %2329 = vmatprep.subr.bf16.mxu0 %v2730_v61  ;;  %v1898_v61 = vld [vmem:[%s3115_s4 + $0x60] sm:$0xff]  }
 0x4c2   :  { %2331 = vmatpush1.bf16.msra.mxu0 %v2732_v62  ;;  %v1899_v62 = vld [vmem:[%s3115_s4 + $0x68] sm:$0xff]  }
 0x4c3   :  { %2333 = vmatprep.subr.bf16.mxu0 %v2733_v63  ;;  %v1646_v63 = vld [vmem:[%s3116_s5 + $0x7] ss:$8 sm:$0x3] }
 0x4c6   :  { %2335 = vmatpush1.bf16.msra.mxu0 %v2735_v1  ;;  %v1155_v1 = vrot.slane %v1646_v63, %v2971_v57 }
 0x4c7   :  { %2337 = vmatprep.subr.bf16.mxu0 %v2736_v2  ;;  %v1159_v2 = vrot.slane %v1646_v63, %v2976_v59 }
 0x4ca   :  { %2339 = vmatpush1.bf16.msra.mxu0 %v2738_v3 }
 0x4cb   :  { %2341 = vmatprep.subr.bf16.mxu0 %v2739_v4 }
 0x4ce   :  { %2343 = vmatpush1.bf16.msra.mxu0 %v2741_v5 }
 0x4cf   :  { %2345 = vmatprep.subr.bf16.mxu0 %v2742_v6 }
 0x4d2   :  { %2347 = vmatpush1.bf16.msra.mxu0 %v2744_v7 }
 0x4d3   :  { %2349 = vmatprep.subr.bf16.mxu0 %v2745_v9 }
 0x4d6   :  { %2351 = vmatpush1.bf16.msra.mxu0 %v2747_v10  ;;  %v1900_v10 = vld [vmem:[%s3115_s4 + $0x70] sm:$0xff]  }
 0x4d7   :  { %2353 = vmatprep.subr.bf16.mxu0 %v2748_v11  ;;  %v1901_v11 = vld [vmem:[%s3115_s4 + $0x78] sm:$0xff]  }
 0x4da   :  { %2355 = vmatpush1.bf16.msra.mxu0 %v2750_v12  ;;  %v2763_v12 = vld [vmem:[#allocation2 + $0xc4] ss:$8 sps:$4 sm:$0xff]  }
 0x4db   :  { %2357 = vmatprep.subr.bf16.mxu0 %v2751_v13  ;;  %v2765_v13 = vld [vmem:[#allocation2 + $0xc0] ss:$8 sps:$4 sm:$0xff]  }
 0x4de   :  { %2359 = vmatpush1.bf16.msra.mxu0 %v2753_v14  ;;  %v2766_v14 = vld [vmem:[#allocation2 + $0xd4] ss:$8 sps:$4 sm:$0xff]  }
 0x4df   :  { %2361 = vmatprep.subr.bf16.mxu0 %v2754_v15  ;;  %v2768_v15 = vld [vmem:[#allocation2 + $0xd0] ss:$8 sps:$4 sm:$0xff]  }
 0x4e2   :  { %2363 = vmatpush1.bf16.msra.mxu0 %v2756_v16  ;;  %v2771_v16 = vld [vmem:[#allocation2 + $0xe0] ss:$8 sps:$4 sm:$0xff]  }
 0x4e3   :  { %2365 = vmatprep.subr.bf16.mxu0 %v2757_v17 }
 0x4e6   :  { %2367 = vmatpush1.bf16.msra.mxu0 %v2759_v18 }
 0x4e7   :  { %2369 = vmatprep.subr.bf16.mxu0 %v2760_v28 }
 0x4ea   :  { %2371 = vmatpush1.bf16.msra.mxu0 %v2762_v29  ;;  %v1663_v29 = vld [vmem:[%s3116_s5 + $0x12] ss:$8 sm:$0x3] }
 0x4eb   :  { %2404 = vmatprep.subr.bf16.mxu0 %v2885_v8  ;;  %v1508_v30 = vrot.slane %v1663_v29, %v2971_v57 }
 0x580   :  { %v862_v22 = vpop.f32.mrb[6].mxu0 }
 0x581   :  { %v863_v23 = vadd.f32 %v862_v22, %v786_v20  ;;  %v864_v24 = vpop.f32.mrb[7].mxu0  ;;  %v2772_v22 = vld [vmem:[#allocation2 + $0xf4] ss:$8 sps:$4 sm:$0xff]  }
 0x582   :  { %v865_v25 = vadd.f32 %v864_v24, %v790_v21  ;;  %v1405_v24 = vld [vmem:[%s3116_s5 + $0x11] ss:$0 sm:$0xff] }
 0x583   :  { %v867_v27 = vmax.f32 %v863_v23, 0.0  ;;  %v2774_v23 = vld [vmem:[#allocation2 + $0xf0] ss:$8 sps:$4 sm:$0xff]  }
 0x584   :  { %v868_v26 = vmax.f32 %v865_v25, 0.0 }
 0x586   :  { %1043 = vmatprep.mubr.f32.mxu1 %v868_v26 }
 0x587   :  { %1044 = vmatmul.mubr.f32.vlgmr.msra.gmra.mrb[4].mxu1 %v867_v27 }
 0x588   :  { %2375 = vmatpush3.bf16.msra.mxu1 %v1762_v31  ;;  %v1512_v31 = vrot.slane %v1663_v29, %v2976_v59 }
 0x589   :  { %2377 = vmatprep.subr.bf16.mxu1 %v1887_v32 }
 0x58c   :  { %2379 = vmatpush3.bf16.msra.mxu1 %v1879_v33 }
 0x58d   :  { %2381 = vmatprep.subr.bf16.mxu1 %v1888_v34 }
 0x590   :  { %2383 = vmatpush3.bf16.msra.mxu1 %v1880_v35 }
 0x591   :  { %2385 = vmatprep.subr.bf16.mxu1 %v1889_v36 }
 0x594   :  { %2387 = vmatpush3.bf16.msra.mxu1 %v1881_v37 }
 0x595   :  { %2389 = vmatprep.subr.bf16.mxu1 %v1890_v38 }
 0x598   :  { %2391 = vmatpush3.bf16.msra.mxu1 %v1882_v39 }
 0x599   :  { %2393 = vmatprep.subr.bf16.mxu1 %v1891_v40 }
 0x59c   :  { %2395 = vmatpush3.bf16.msra.mxu1 %v1883_v41 }
 0x59d   :  { %2397 = vmatprep.subr.bf16.mxu1 %v1892_v42 }
 0x5a0   :  { %2399 = vmatpush3.bf16.msra.mxu1 %v1884_v52 }
 0x5a1   :  { %2401 = vmatprep.subr.bf16.mxu1 %v1893_v53 }
 0x5a4   :  { %2403 = vmatpush3.bf16.msra.mxu1 %v1885_v54 }
 0x5a5   :  { %2429 = vmatprep.subr.bf16.mxu1 %v2763_v12 }
 0x65a   :  { %v1045_v46 = vpop.f32.mrb[4].mxu1 }
 0x65b   :  { %v1046_v47 = vadd.f32 %v1045_v46, %v972_v44  ;;  %v1047_v48 = vpop.f32.mrb[5].mxu1 }
 0x65c   :  { %v1048_v49 = vadd.f32 %v1047_v48, %v976_v45 }
 0x65d   :  { %v1050_v51 = vmax.f32 %v1046_v47, 0.0 }
 0x65e   :  { %v1051_v50 = vmax.f32 %v1048_v49, 0.0 }
 0x660   :  { %1226 = vmatprep.mubr.f32.mxu0 %v1051_v50 }
 0x661   :  { %1227 = vmatmul.mubr.f32.vlgmr.msra.gmra.mrb[8].mxu0 %v1050_v51 }
 0x662   :  { %2073 = vmatprep.mubr.msk.f32.mxu0 %vm2886_vm1, %v2884_v0  ;;  %2406 = vmatpush3.bf16.msra.mxu0 %v1894_v55 }
 0x663   :  { %2407 = vmatprep.subr.bf16.mxu0 %v2885_v8 }
 0x666   :  { %2409 = vmatpush3.bf16.msra.mxu0 %v1895_v56 }
 0x667   :  { %2410 = vmatprep.subr.bf16.mxu0 %v2885_v8 }
 0x66a   :  { %2412 = vmatpush3.bf16.msra.mxu0 %v1896_v58 }
 0x66b   :  { %2413 = vmatprep.subr.bf16.mxu0 %v2885_v8 }
 0x66e   :  { %2415 = vmatpush3.bf16.msra.mxu0 %v1897_v60 }
 0x66f   :  { %2416 = vmatprep.subr.bf16.mxu0 %v2885_v8 }
 0x672   :  { %2418 = vmatpush3.bf16.msra.mxu0 %v1898_v61 }
 0x673   :  { %2419 = vmatprep.subr.bf16.mxu0 %v2885_v8 }
 0x676   :  { %2421 = vmatpush3.bf16.msra.mxu0 %v1899_v62 }
 0x677   :  { %2422 = vmatprep.subr.bf16.mxu0 %v2885_v8 }
 0x67a   :  { %2424 = vmatpush3.bf16.msra.mxu0 %v1900_v10 }
 0x67b   :  { %2425 = vmatprep.subr.bf16.mxu0 %v2885_v8  ;;  %v1300_v8 = vld [vmem:[%s3116_s5 + $0x10] ss:$0 sm:$0xff]  ;;  %s2887_s5 = smov [#allocation8]  }
 0x67c   :  { %s1629_s12 = sshll.u32 %s2887_s5, 4  ;;  %s1630_s12 = int_to_ptr.vmem [resolvable:$true] %s1629_s12 }
 0x67d   :  { %s2849_s0 = scalar_lea.vmem %s1630_s12, 512  ;;  %p2854_p11 = scmp.lt.s32.totalorder %s1630_s12, %s1630_s12 }
 0x67e   :  { %2427 = vmatpush3.bf16.msra.mxu0 %v1901_v11  ;;  %p2850_p10 = scmp.ne.s32.totalorder %s1630_s12, %s2849_s0  ;;  %p2855_p12 = scmp.lt.s32.totalorder %s2849_s0, %s2849_s0 }
 0x680   :  { %p2856_p13 = por %p2855_p12, %p2854_p11 }
 0x682   :  { %p2857_p0 = pnand %p2856_p13, %p2850_p10 }
 0x734   :  { %v1228_v3 = vpop.f32.mrb[8].mxu0 }
 0x735   :  { %v1229_v4 = vadd.f32 %v1228_v3, %v1155_v1  ;;  %v1230_v5 = vpop.f32.mrb[9].mxu0 }
 0x736   :  { %v1231_v6 = vadd.f32 %v1230_v5, %v1159_v2 }
 0x737   :  { %v1233_v9 = vmax.f32 %v1229_v4, 0.0 }
 0x738   :  { %v1234_v7 = vmax.f32 %v1231_v6, 0.0 }
 0x73a   :  { %1365 = vmatprep.mubr.f32.mxu1 %v1234_v7 }
 0x73b   :  { %1366 = vmatmul.mubr.f32.vlgmr.msra.gmra.mrb[6].mxu1 %v1233_v9 }
 0x73c   :  { %1582 = vmatprep.mubr.f32.mxu1 %v2884_v0  ;;  %2431 = vmatpush1.bf16.msra.mxu1 %v2765_v13  ;;  %v2769_v0 = vld [vmem:[#allocation2 + $0xe4] ss:$8 sps:$4 sm:$0xff]  }
 0x73d   :  { %2433 = vmatprep.subr.bf16.mxu1 %v2766_v14 }
 0x740   :  { %2435 = vmatpush1.bf16.msra.mxu1 %v2768_v15 }
 0x741   :  { %2437 = vmatprep.subr.bf16.mxu1 %v2769_v0 }
 0x744   :  { %2439 = vmatpush1.bf16.msra.mxu1 %v2771_v16 }
 0x745   :  { %2441 = vmatprep.subr.bf16.mxu1 %v2772_v22 }
 0x748   :  { %2443 = vmatpush1.bf16.msra.mxu1 %v2774_v23 }
 0x80e   :  { %v1986_v17 = vpop.f32.mrb[6].mxu1 }
 0x80f   :  { %v1987_v18 = vpop.f32.mrb[7].mxu1 }
 0x810   :  { %v1988_v19 = vadd.f32 %v1987_v18, %v1986_v17 }
 0x812   :  { %v1368_v20 = vadd.f32 %v1988_v19, %v1300_v8 }
 0x814   :  { %v1371_v21 = vmax.f32 %v1368_v20, 0.0 }
 0x816   :  { %2074 = vmatmul.mubr.f32.vlgmr.msra.gmra.mrb[10].mxu0 %v1371_v21 }
 0x8e9   :  { %v1472_v25 = vpop.f32.mrb[10].mxu0 }
 0x8ea   :  { %v1473_v26 = vadd.f32 %v1472_v25, %v1405_v24  ;;  %v2075_v27 = vpop.f32.mrb[11].mxu0 }
 0x8ec   :  { %v1476_v28 = vmax.f32 %v1473_v26, 0.0 }
 0x8ee   :  { %1664 = vmatmul.mubr.msk.f32.vlgmr.msra.gmra.mrb[8].mxu1 %vm106_vm0, %v1476_v28 }
 0x9c1   :  { %v1584_v32 = vpop.f32.mrb[8].mxu1 }
 0x9c2   :  { %v1585_v33 = vadd.f32 %v1584_v32, %v1508_v30  ;;  %v1586_v34 = vpop.f32.mrb[9].mxu1 }
 0x9c3   :  { %v1587_v35 = vadd.f32 %v1586_v34, %v1512_v31 }
 0x9c4   :  { %1621 = vst [vmem:[#allocation8 + $0x10] sm:$0xff] %v1585_v33 }
 0x9c5   :  { %v1592_v36 = vand.u32 2147483647, %v1587_v35  ;;  %v1590_v59 = vmax.f32 %v1587_v35, 0.0 }
 0x9c7   :  { %v1594_v37 = vsub.f32 0.0, %v1592_v36 }
 0x9c9   :  { %v1597_v38 = vmul.f32 1.442695, %v1594_v37 }
 0x9cb   :  { %2779 = vpow2.f32 %v1597_v38 }
 0x9d5   :  { %v2780_v39 = vpop.eup %2779 }
 0x9d6   :  { %v1608_v40 = vadd.f32 1.0, %v2780_v39  ;;  %v1611_v41 = vmul.f32 -0.5, %v2780_v39  ;;  %v1614_v43 = vand.u32 2147483647, %v2780_v39 }
 0x9d8   :  { %2781 = vlog2.f32 %v1608_v40  ;;  %v1612_v42 = vadd.f32 1.0, %v1611_v41  ;;  %vm1615_vm3 = vcmp.lt.f32.partialorder %v1614_v43, 0.0004427343 }
 0x9da   :  { %v1613_v57 = vmul.f32 %v2780_v39, %v1612_v42 }
 0x9e2   :  { %v2782_v44 = vpop.eup %2781 }
 0x9e3   :  { %v1610_v45 = vmul.f32 0.6931472, %v2782_v44 }
 0x9e5   :  { %v1616_v46 = vsel %vm1615_vm3, %v1613_v57, %v1610_v45 }
 0x9e6   :  { %v1618_v47 = vadd.f32 %v1616_v46, %v1590_v59 }
 0x9e8   :  { %1622 = vst [vmem:[#allocation8 + $0x18] sm:$0xff] %v1618_v47 }
 0x9e9   :  { %2860 = shalt.err (!%p2857_p0)
}
 0x9ea   :  { %s2861_s15 = scalar_lea.hbm %s3117_s6, 512 }
 0x9eb   :  { %p2862_p1 = scmp.ne.s32.totalorder %s3117_s6, %s2861_s15  ;;  %p2865_p2 = scmp.lt.u32.totalorder %s2861_s15, %s3117_s6 }
 0x9ed   :  { %p2867_p3 = pnand %p2865_p2, %p2862_p1 }
 0x9ef   :  { %2870 = shalt.err (!%p2867_p3)
}
 0x9f0   :  { %1632 = dma.vmem_to_hbm [thread:$0]  %s1630_s12, 512, %s3117_s6, [#allocation4]  }
 0x9f1   :  { %2875 = dma.done.wait [#allocation4], 512  }
 0x9f2   :  { %2876 = vsyncadd [#allocation4], 4294966784 }
 0x9f3   :  { %1636 = vsyncpa [#allocation3], 1 }
 0x9f4   :  { %1637 = vsyncpa [#allocation6], 1 }
 0x9f5   :  { %1638 = vsyncpa [#allocation4], 1 }

</bundles_post_ra>
